<compile_context>
chip_gen: v6e
topology: v6e:2x2x1
jax: 0.10.0
libtpu: 0.0.40
codegen_flags: <defaults>
</compile_context>

<pallas_src>
import jax
import jax.numpy as jnp
import numpy as np
from jax.experimental import pallas as pl
from jax.experimental.pallas import tpu as pltpu

LN_EPS = 1e-5          # torch.nn.LayerNorm default
_NEG_BIG = -1e30       # bias value for padded (fake) classes


def _sced_class_head_kernel(xs_ref, xc_ref, gs_ref, gc_ref, bs_ref, bc_ref,
                            ws_ref, wc_ref, bias_ref, o_ref):
    # xs_ref / xc_ref : (TB, L, F) bf16 -- the two halves of the concatenated features.
    xs = xs_ref[...].astype(jnp.float32)
    xc = xc_ref[...].astype(jnp.float32)
    f = xs.shape[-1]
    inv_2f = 1.0 / (2.0 * f)

    # nn.LayerNorm statistics over the (virtual) concatenated 2F feature axis
    # (biased variance, eps=1e-5), computed from the two halves.
    mu = (jnp.sum(xs, axis=-1, keepdims=True)
          + jnp.sum(xc, axis=-1, keepdims=True)) * inv_2f            # (TB, L, 1)
    ds = xs - mu
    dc = xc - mu
    var = (jnp.sum(ds * ds, axis=-1, keepdims=True)
           + jnp.sum(dc * dc, axis=-1, keepdims=True)) * inv_2f      # (TB, L, 1)
    inv = jax.lax.rsqrt(var + LN_EPS)                                # (TB, L, 1)

    # AdaptiveAvgPool1d(1) over L.  The per-feature LN affine commutes with the
    # mean over L, so gamma/beta are applied once per (batch, feature).
    phat_s = jnp.mean(ds * inv, axis=1)                              # (TB, F)
    phat_c = jnp.mean(dc * inv, axis=1)                              # (TB, F)
    pooled_s = phat_s * gs_ref[...] + bs_ref[...]                    # (TB, F)
    pooled_c = phat_c * gc_ref[...] + bc_ref[...]                    # (TB, F)

    # class_head: Linear(2F -> NCp) as two MXU matmuls over the halves.
    logits = (jnp.dot(pooled_s, ws_ref[...], preferred_element_type=jnp.float32)
              + jnp.dot(pooled_c, wc_ref[...], preferred_element_type=jnp.float32)
              + bias_ref[...])                                       # (TB, NCp)

    # nn.Softmax() over the class dim; padded classes carry bias=-1e30 -> exp ~ 0.
    m = jnp.max(logits, axis=-1, keepdims=True)
    e = jnp.exp(logits - m)
    denom = jnp.sum(e, axis=-1, keepdims=True)
    o_ref[...] = (e * pl.reciprocal(denom, approx=True)).astype(o_ref.dtype)


def _round_up(x, m):
    return ((x + m - 1) // m) * m


def _choose_batch_tile(b_pad, l, f, act_bytes=2, budget_bytes=12 * 1024 * 1024):
    """Largest multiple-of-8 batch tile whose double-buffered bf16 activations
    fit a conservative VMEM budget (safe on v5e/v6e/v7x scoped-VMEM defaults)."""
    per_row = 2 * l * f * act_bytes            # both feature halves, one batch row
    tb = budget_bytes // max(1, 2 * per_row)   # x2 for double buffering
    tb = max(8, min(256, (tb // 8) * 8))       # 8-sublane aligned, cap at 256 (MXU M)
    return min(tb, b_pad)


def sced_class_head(x_st, x_cnn, gamma, beta, w_t, bias):
    """Pallas implementation of SCEDNet.forward (mode='class') head.

    x_st : (B, L, F)       Swin-transformer features
    x_cnn: (B, F, h, w)    CNN features (NCHW), h*w == L
    gamma, beta : (2F,)    LayerNorm affine params
    w_t  : (2F, NC)        class_head weight, already transposed (torch stores (NC, 2F))
    bias : (NC,)           class_head bias
    """
    B, L, F = x_st.shape
    Cc = x_cnn.shape[1]
    assert Cc == F, "CNN channel count must equal ST feature dim"
    # torch: x_CNN.reshape(B, -1, C) is a *raw* row-major reshape of the NCHW buffer
    # (it mixes channel/spatial order); jnp.reshape has identical semantics.
    x_cnn_seq = jnp.reshape(x_cnn, (B, -1, Cc))
    assert x_cnn_seq.shape[1] == L, "CNN spatial size must match ST sequence length"

    NC = w_t.shape[-1]
    NCp = _round_up(NC, 128)                   # lane-dense output store

    # bf16 activations halve HBM->VMEM traffic for this memory-bound head.
    x_st_b = x_st.astype(jnp.bfloat16)
    x_cnn_b = x_cnn_seq.astype(jnp.bfloat16)

    # Batch tiling + zero padding (padded rows produce finite garbage, sliced off).
    B8 = _round_up(B, 8)
    TB = _choose_batch_tile(B8, L, F)
    Bp = _round_up(B8, TB)
    if Bp != B:
        pad = [(0, Bp - B), (0, 0), (0, 0)]
        x_st_b = jnp.pad(x_st_b, pad)
        x_cnn_b = jnp.pad(x_cnn_b, pad)

    gamma = gamma.astype(jnp.float32)
    beta = beta.astype(jnp.float32)
    gs = gamma[:F].reshape(1, F)
    gc = gamma[F:].reshape(1, F)
    bs = beta[:F].reshape(1, F)
    bc = beta[F:].reshape(1, F)

    w_t = w_t.astype(jnp.float32)
    ws = jnp.pad(w_t[:F], ((0, 0), (0, NCp - NC)))       # zero columns for pad classes
    wc = jnp.pad(w_t[F:], ((0, 0), (0, NCp - NC)))
    bias_p = jnp.pad(bias.astype(jnp.float32), (0, NCp - NC),
                     constant_values=_NEG_BIG).reshape(1, NCp)

    rep2 = lambda i: (0, 0)
    out = pl.pallas_call(
        _sced_class_head_kernel,
        out_shape=jax.ShapeDtypeStruct((Bp, NCp), jnp.float32),
        grid_spec=pltpu.PrefetchScalarGridSpec(
            num_scalar_prefetch=0,
            grid=(Bp // TB,),
            in_specs=[
                pl.BlockSpec((TB, L, F), lambda i: (i, 0, 0)),   # x_ST half (bf16)
                pl.BlockSpec((TB, L, F), lambda i: (i, 0, 0)),   # x_CNN half (bf16)
                pl.BlockSpec((1, F), rep2),                      # gamma[:F]
                pl.BlockSpec((1, F), rep2),                      # gamma[F:]
                pl.BlockSpec((1, F), rep2),                      # beta[:F]
                pl.BlockSpec((1, F), rep2),                      # beta[F:]
                pl.BlockSpec((F, NCp), rep2),                    # W^T[:F]  (NC padded)
                pl.BlockSpec((F, NCp), rep2),                    # W^T[F:]  (NC padded)
                pl.BlockSpec((1, NCp), rep2),                    # bias (pad = -1e30)
            ],
            out_specs=pl.BlockSpec((TB, NCp), lambda i: (i, 0)),
        ),
        compiler_params=pltpu.CompilerParams(
            dimension_semantics=("parallel",),
            vmem_limit_bytes=32 * 1024 * 1024),
    )(x_st_b, x_cnn_b, gs, gc, bs, bc, ws, wc, bias_p)
    return out[:B, :NC]                                          # (B, NC)


def _reference_class_head(x_st, x_cnn, gamma, beta, w_t, bias):
    """Pure-JAX reference mirroring the torch class-mode path."""
    B = x_cnn.shape[0]
    Cc = x_cnn.shape[1]
    x = jnp.concatenate([x_st, jnp.reshape(x_cnn, (B, -1, Cc))], axis=2)
    x = x.astype(jnp.float32)
    mu = x.mean(-1, keepdims=True)
    var = jnp.square(x - mu).mean(-1, keepdims=True)
    xn = (x - mu) / jnp.sqrt(var + LN_EPS) * gamma + beta
    pooled = xn.mean(axis=1)
    logits = pooled @ w_t + bias
    return jax.nn.softmax(logits, axis=-1)


# ---------------------------------------------------------------------------
# Placeholder encoders (plain-JAX glue).
# TODO(synk): SwinTransformer / CNN / DoubleConv definitions were not provided
# in the source; these deterministic projections only reproduce the *shapes*
# the encoders feed into the SCEDNet class-mode head (the part actually
# implemented as the Pallas kernel above).
# ---------------------------------------------------------------------------
def _pool_nchw(x, h_out, w_out):
    B, C, H, W = x.shape
    return x.reshape(B, C, h_out, H // h_out, w_out, W // w_out).mean(axis=(3, 5))


def fake_cnn_encoder(x, w_proj, h_out, w_out):
    # (B, Ci, H, W) -> (B, F, h_out, w_out), NCHW like the torch CNN branch.
    pooled = _pool_nchw(x, h_out, w_out)                    # (B, Ci, h, w)
    return jnp.einsum("fc,bchw->bfhw", w_proj, pooled)


def fake_swin_encoder(x, w_proj, h_out, w_out):
    # (B, Ci, H, W) -> (B, L, F) token sequence like the torch Swin branch.
    pooled = _pool_nchw(x, h_out, w_out)                    # (B, Ci, h, w)
    B, Ci = pooled.shape[:2]
    tokens = pooled.reshape(B, Ci, -1).transpose(0, 2, 1)   # (B, L, Ci)
    return tokens @ w_proj                                  # (B, L, F)


if __name__ == "__main__":
    # Small config consistent with SCEDNet defaults, scaled down:
    #   in_ch=3, img_size=64, patch_size=4, embed_dim=8, depths=[2,2,6,2]
    #   -> num_features = embed_dim * 2**3 = 64, final resolution 2x2 (L=4)
    B, Ci, H, W = 2, 3, 64, 64
    embed_dim = 8
    num_features = embed_dim * 2 ** 3          # 64
    h_out = w_out = 2
    L = h_out * w_out                          # 4
    F2 = 2 * num_features                      # 128
    num_classes = 16

    key = jax.random.PRNGKey(0)
    k_x, k_wc, k_ws, k_g, k_b, k_w, k_bias = jax.random.split(key, 7)

    x = jax.random.normal(k_x, (B, Ci, H, W), dtype=jnp.float32)

    # deterministic placeholder encoder weights
    w_cnn = jax.random.normal(k_wc, (num_features, Ci), dtype=jnp.float32) * 0.2
    w_st = jax.random.normal(k_ws, (Ci, num_features), dtype=jnp.float32) * 0.2

    x_cnn = fake_cnn_encoder(x, w_cnn, h_out, w_out)        # (B, 64, 2, 2)
    x_st = fake_swin_encoder(x, w_st, h_out, w_out)         # (B, 4, 64)

    # SCEDNet class-mode head parameters (deterministic synthetic init).
    gamma = 1.0 + 0.1 * jax.random.normal(k_g, (F2,), dtype=jnp.float32)
    beta = 0.1 * jax.random.normal(k_b, (F2,), dtype=jnp.float32)
    w_t = jax.random.normal(k_w, (F2, num_classes), dtype=jnp.float32) * 0.1
    bias = 0.1 * jax.random.normal(k_bias, (num_classes,), dtype=jnp.float32)

    out = sced_class_head(x_st, x_cnn, gamma, beta, w_t, bias)
    out = jax.block_until_ready(out)

    # Reference evaluated on the same bf16-quantized activations the kernel DMAs.
    x_st_q = x_st.astype(jnp.bfloat16).astype(jnp.float32)
    x_cnn_q = x_cnn.astype(jnp.bfloat16).astype(jnp.float32)
    ref = _reference_class_head(x_st_q, x_cnn_q, gamma, beta, w_t, bias)

    np.testing.assert_allclose(np.asarray(out), np.asarray(ref), rtol=3e-2, atol=5e-3)
    assert out.shape == (B, num_classes)
    # softmax rows sum to ~1 (approx reciprocal -> loose tolerance)
    np.testing.assert_allclose(np.asarray(out).sum(axis=-1), np.ones(B), atol=5e-3)

    print("KERNEL_OK")
</pallas_src>

<mosaic_0001>
module attributes {stable_mosaic.version = 11 : i64} {
  func.func @_sced_class_head_kernel(%arg0: i32, %arg1: memref<8x4x64xbf16, #tpu.memory_space<vmem>>, %arg2: memref<8x4x64xbf16, #tpu.memory_space<vmem>>, %arg3: memref<1x64xf32, #tpu.memory_space<vmem>>, %arg4: memref<1x64xf32, #tpu.memory_space<vmem>>, %arg5: memref<1x64xf32, #tpu.memory_space<vmem>>, %arg6: memref<1x64xf32, #tpu.memory_space<vmem>>, %arg7: memref<64x128xf32, #tpu.memory_space<vmem>>, %arg8: memref<64x128xf32, #tpu.memory_space<vmem>>, %arg9: memref<1x128xf32, #tpu.memory_space<vmem>>, %arg10: memref<8x128xf32, #tpu.memory_space<vmem>>) attributes {dimension_semantics = [#tpu.dimension_semantics<parallel>], iteration_bounds = array<i64: 1>, scalar_prefetch = 0 : i64, scratch_operands = 0 : i64, tpu.core_type = #tpu.core_type<tc>, window_params = [{transform_indices = @transform_0, window_bounds = array<i64: 8, 4, 64>}, {transform_indices = @transform_1, window_bounds = array<i64: 8, 4, 64>}, {pipeline_mode = #tpu.pipeline_mode<synchronous>, transform_indices = @transform_2, window_bounds = array<i64: 1, 64>}, {pipeline_mode = #tpu.pipeline_mode<synchronous>, transform_indices = @transform_3, window_bounds = array<i64: 1, 64>}, {pipeline_mode = #tpu.pipeline_mode<synchronous>, transform_indices = @transform_4, window_bounds = array<i64: 1, 64>}, {pipeline_mode = #tpu.pipeline_mode<synchronous>, transform_indices = @transform_5, window_bounds = array<i64: 1, 64>}, {pipeline_mode = #tpu.pipeline_mode<synchronous>, transform_indices = @transform_6, window_bounds = array<i64: 64, 128>}, {pipeline_mode = #tpu.pipeline_mode<synchronous>, transform_indices = @transform_7, window_bounds = array<i64: 64, 128>}, {pipeline_mode = #tpu.pipeline_mode<synchronous>, transform_indices = @transform_8, window_bounds = array<i64: 1, 128>}, {transform_indices = @transform_9, window_bounds = array<i64: 8, 128>}]} {
    %c0 = arith.constant 0 : index
    %c0_0 = arith.constant 0 : index
    %c0_1 = arith.constant 0 : index
    %0 = vector.load %arg1[%c0, %c0_0, %c0_1] : memref<8x4x64xbf16, #tpu.memory_space<vmem>>, vector<8x4x64xbf16>
    %1 = arith.extf %0 : vector<8x4x64xbf16> to vector<8x4x64xf32>
    %c0_2 = arith.constant 0 : index
    %c0_3 = arith.constant 0 : index
    %c0_4 = arith.constant 0 : index
    %2 = vector.load %arg2[%c0_2, %c0_3, %c0_4] : memref<8x4x64xbf16, #tpu.memory_space<vmem>>, vector<8x4x64xbf16>
    %3 = arith.extf %2 : vector<8x4x64xbf16> to vector<8x4x64xf32>
    %cst = arith.constant dense<0.000000e+00> : vector<8x4xf32>
    %4 = vector.multi_reduction <add>, %1, %cst [2] : vector<8x4x64xf32> to vector<8x4xf32>
    %5 = vector.shape_cast %4 : vector<8x4xf32> to vector<8x4x1xf32>
    %cst_5 = arith.constant dense<0.000000e+00> : vector<8x4xf32>
    %6 = vector.multi_reduction <add>, %3, %cst_5 [2] : vector<8x4x64xf32> to vector<8x4xf32>
    %7 = vector.shape_cast %6 : vector<8x4xf32> to vector<8x4x1xf32>
    %8 = arith.addf %5, %7 : vector<8x4x1xf32>
    %cst_6 = arith.constant 7.812500e-03 : f32
    %9 = vector.broadcast %cst_6 : f32 to vector<8x4x1xf32>
    %10 = arith.mulf %8, %9 : vector<8x4x1xf32>
    %11 = vector.broadcast %10 : vector<8x4x1xf32> to vector<8x4x64xf32>
    %12 = arith.subf %1, %11 : vector<8x4x64xf32>
    %13 = vector.broadcast %10 : vector<8x4x1xf32> to vector<8x4x64xf32>
    %14 = arith.subf %3, %13 : vector<8x4x64xf32>
    %15 = arith.mulf %12, %12 : vector<8x4x64xf32>
    %cst_7 = arith.constant dense<0.000000e+00> : vector<8x4xf32>
    %16 = vector.multi_reduction <add>, %15, %cst_7 [2] : vector<8x4x64xf32> to vector<8x4xf32>
    %17 = vector.shape_cast %16 : vector<8x4xf32> to vector<8x4x1xf32>
    %18 = arith.mulf %14, %14 : vector<8x4x64xf32>
    %cst_8 = arith.constant dense<0.000000e+00> : vector<8x4xf32>
    %19 = vector.multi_reduction <add>, %18, %cst_8 [2] : vector<8x4x64xf32> to vector<8x4xf32>
    %20 = vector.shape_cast %19 : vector<8x4xf32> to vector<8x4x1xf32>
    %21 = arith.addf %17, %20 : vector<8x4x1xf32>
    %cst_9 = arith.constant 7.812500e-03 : f32
    %22 = vector.broadcast %cst_9 : f32 to vector<8x4x1xf32>
    %23 = arith.mulf %21, %22 : vector<8x4x1xf32>
    %cst_10 = arith.constant 9.99999974E-6 : f32
    %24 = vector.broadcast %cst_10 : f32 to vector<8x4x1xf32>
    %25 = arith.addf %23, %24 : vector<8x4x1xf32>
    %26 = math.rsqrt %25 : vector<8x4x1xf32>
    %27 = vector.broadcast %26 : vector<8x4x1xf32> to vector<8x4x64xf32>
    %28 = arith.mulf %12, %27 : vector<8x4x64xf32>
    %cst_11 = arith.constant dense<0.000000e+00> : vector<8x64xf32>
    %29 = vector.multi_reduction <add>, %28, %cst_11 [1] : vector<8x4x64xf32> to vector<8x64xf32>
    %cst_12 = arith.constant 4.000000e+00 : f32
    %30 = vector.broadcast %cst_12 : f32 to vector<8x64xf32>
    %31 = arith.divf %29, %30 : vector<8x64xf32>
    %32 = vector.broadcast %26 : vector<8x4x1xf32> to vector<8x4x64xf32>
    %33 = arith.mulf %14, %32 : vector<8x4x64xf32>
    %cst_13 = arith.constant dense<0.000000e+00> : vector<8x64xf32>
    %34 = vector.multi_reduction <add>, %33, %cst_13 [1] : vector<8x4x64xf32> to vector<8x64xf32>
    %cst_14 = arith.constant 4.000000e+00 : f32
    %35 = vector.broadcast %cst_14 : f32 to vector<8x64xf32>
    %36 = arith.divf %34, %35 : vector<8x64xf32>
    %c0_15 = arith.constant 0 : index
    %c0_16 = arith.constant 0 : index
    %37 = vector.load %arg3[%c0_15, %c0_16] : memref<1x64xf32, #tpu.memory_space<vmem>>, vector<1x64xf32>
    %38 = vector.broadcast %37 : vector<1x64xf32> to vector<8x64xf32>
    %39 = arith.mulf %31, %38 : vector<8x64xf32>
    %c0_17 = arith.constant 0 : index
    %c0_18 = arith.constant 0 : index
    %40 = vector.load %arg5[%c0_17, %c0_18] : memref<1x64xf32, #tpu.memory_space<vmem>>, vector<1x64xf32>
    %41 = vector.broadcast %40 : vector<1x64xf32> to vector<8x64xf32>
    %42 = arith.addf %39, %41 : vector<8x64xf32>
    %c0_19 = arith.constant 0 : index
    %c0_20 = arith.constant 0 : index
    %43 = vector.load %arg4[%c0_19, %c0_20] : memref<1x64xf32, #tpu.memory_space<vmem>>, vector<1x64xf32>
    %44 = vector.broadcast %43 : vector<1x64xf32> to vector<8x64xf32>
    %45 = arith.mulf %36, %44 : vector<8x64xf32>
    %c0_21 = arith.constant 0 : index
    %c0_22 = arith.constant 0 : index
    %46 = vector.load %arg6[%c0_21, %c0_22] : memref<1x64xf32, #tpu.memory_space<vmem>>, vector<1x64xf32>
    %47 = vector.broadcast %46 : vector<1x64xf32> to vector<8x64xf32>
    %48 = arith.addf %45, %47 : vector<8x64xf32>
    %c0_23 = arith.constant 0 : index
    %c0_24 = arith.constant 0 : index
    %49 = vector.load %arg7[%c0_23, %c0_24] : memref<64x128xf32, #tpu.memory_space<vmem>>, vector<64x128xf32>
    %cst_25 = arith.constant dense<0.000000e+00> : vector<8x128xf32>
    %50 = tpu.matmul %42, %49, %cst_25 {dimension_numbers = #tpu.dot_dimension_numbers<[1], [0], [0], [1], [0, 0, 1, 1], [], []>} : vector<8x64xf32>, vector<64x128xf32>, vector<8x128xf32> -> vector<8x128xf32>
    %c0_26 = arith.constant 0 : index
    %c0_27 = arith.constant 0 : index
    %51 = vector.load %arg8[%c0_26, %c0_27] : memref<64x128xf32, #tpu.memory_space<vmem>>, vector<64x128xf32>
    %cst_28 = arith.constant dense<0.000000e+00> : vector<8x128xf32>
    %52 = tpu.matmul %48, %51, %cst_28 {dimension_numbers = #tpu.dot_dimension_numbers<[1], [0], [0], [1], [0, 0, 1, 1], [], []>} : vector<8x64xf32>, vector<64x128xf32>, vector<8x128xf32> -> vector<8x128xf32>
    %53 = arith.addf %50, %52 : vector<8x128xf32>
    %c0_29 = arith.constant 0 : index
    %c0_30 = arith.constant 0 : index
    %54 = vector.load %arg9[%c0_29, %c0_30] : memref<1x128xf32, #tpu.memory_space<vmem>>, vector<1x128xf32>
    %55 = vector.broadcast %54 : vector<1x128xf32> to vector<8x128xf32>
    %56 = arith.addf %53, %55 : vector<8x128xf32>
    %cst_31 = arith.constant dense<0xFF800000> : vector<8xf32>
    %57 = vector.multi_reduction <maximumf>, %56, %cst_31 [1] : vector<8x128xf32> to vector<8xf32>
    %58 = vector.shape_cast %57 : vector<8xf32> to vector<8x1xf32>
    %59 = vector.broadcast %58 : vector<8x1xf32> to vector<8x128xf32>
    %60 = arith.subf %56, %59 : vector<8x128xf32>
    %61 = math.exp %60 : vector<8x128xf32>
    %cst_32 = arith.constant dense<0.000000e+00> : vector<8xf32>
    %62 = vector.multi_reduction <add>, %61, %cst_32 [1] : vector<8x128xf32> to vector<8xf32>
    %63 = vector.shape_cast %62 : vector<8xf32> to vector<8x1xf32>
    %64 = tpu.reciprocal %63 {approx = true} : vector<8x1xf32> -> vector<8x1xf32>
    %65 = vector.broadcast %64 : vector<8x1xf32> to vector<8x128xf32>
    %66 = arith.mulf %61, %65 : vector<8x128xf32>
    %c0_33 = arith.constant 0 : index
    %c0_34 = arith.constant 0 : index
    %67 = vector.load %arg10[%c0_33, %c0_34] : memref<8x128xf32, #tpu.memory_space<vmem>>, vector<8x128xf32>
    tpu.vector_store %arg10[%c0_33, %c0_34], %66 {strides = array<i32>} : memref<8x128xf32, #tpu.memory_space<vmem>>, vector<8x128xf32>,
    return
  }
  func.func @transform_0(%arg0: i32) -> (i32, i32, i32) {
    %c0_i32 = arith.constant 0 : i32
    %c0_i32_0 = arith.constant 0 : i32
    %c0_i32_1 = arith.constant 0 : i32
    return %arg0, %c0_i32, %c0_i32_0 : i32, i32, i32
  }
  func.func @transform_1(%arg0: i32) -> (i32, i32, i32) {
    %c0_i32 = arith.constant 0 : i32
    %c0_i32_0 = arith.constant 0 : i32
    %c0_i32_1 = arith.constant 0 : i32
    return %arg0, %c0_i32, %c0_i32_0 : i32, i32, i32
  }
  func.func @transform_2(%arg0: i32) -> (i32, i32) {
    %c0_i32 = arith.constant 0 : i32
    %c0_i32_0 = arith.constant 0 : i32
    %c0_i32_1 = arith.constant 0 : i32
    return %c0_i32, %c0_i32_0 : i32, i32
  }
  func.func @transform_3(%arg0: i32) -> (i32, i32) {
    %c0_i32 = arith.constant 0 : i32
    %c0_i32_0 = arith.constant 0 : i32
    %c0_i32_1 = arith.constant 0 : i32
    return %c0_i32, %c0_i32_0 : i32, i32
  }
  func.func @transform_4(%arg0: i32) -> (i32, i32) {
    %c0_i32 = arith.constant 0 : i32
    %c0_i32_0 = arith.constant 0 : i32
    %c0_i32_1 = arith.constant 0 : i32
    return %c0_i32, %c0_i32_0 : i32, i32
  }
  func.func @transform_5(%arg0: i32) -> (i32, i32) {
    %c0_i32 = arith.constant 0 : i32
    %c0_i32_0 = arith.constant 0 : i32
    %c0_i32_1 = arith.constant 0 : i32
    return %c0_i32, %c0_i32_0 : i32, i32
  }
  func.func @transform_6(%arg0: i32) -> (i32, i32) {
    %c0_i32 = arith.constant 0 : i32
    %c0_i32_0 = arith.constant 0 : i32
    %c0_i32_1 = arith.constant 0 : i32
    return %c0_i32, %c0_i32_0 : i32, i32
  }
  func.func @transform_7(%arg0: i32) -> (i32, i32) {
    %c0_i32 = arith.constant 0 : i32
    %c0_i32_0 = arith.constant 0 : i32
    %c0_i32_1 = arith.constant 0 : i32
    return %c0_i32, %c0_i32_0 : i32, i32
  }
  func.func @transform_8(%arg0: i32) -> (i32, i32) {
    %c0_i32 = arith.constant 0 : i32
    %c0_i32_0 = arith.constant 0 : i32
    %c0_i32_1 = arith.constant 0 : i32
    return %c0_i32, %c0_i32_0 : i32, i32
  }
  func.func @transform_9(%arg0: i32) -> (i32, i32) {
    %c0_i32 = arith.constant 0 : i32
    %c0_i32_0 = arith.constant 0 : i32
    return %arg0, %c0_i32 : i32, i32
  }
}

</mosaic_0001>

<bundles_post_ra>
// kernel: tpu_custom_call.1
= control target key start
LH: loop header
LB: loop body
LE: loop exit
PB: predicated region body
PF: predicated region fallthrough
CT: control target
= control target key end

     0   :  { %14 = vsyncpa [#allocation3], 0  ;;  %s1330_s0 = inlined_call_operand.hbm [shape: bf16[8,4,64], index: 0, kind: input, shape index: {}]   ;;  %s1331_s1 = inlined_call_operand.hbm [shape: bf16[8,4,64], index: 1, kind: input, shape index: {}]   ;;  %s1332_s2 = inlined_call_operand.vmem [shape: f32[1,64], index: 2, kind: input, shape index: {}]   ;;  %s1333_s3 = inlined_call_operand.vmem [shape: f32[1,64], index: 3, kind: input, shape index: {}]   ;;  %s1334_s4 = inlined_call_operand.vmem [shape: f32[1,64], index: 4, kind: input, shape index: {}]   ;;  %s1335_s5 = inlined_call_operand.vmem [shape: f32[1,64], index: 5, kind: input, shape index: {}]   ;;  %s1336_s6 = inlined_call_operand.hbm [shape: f32[64,128], index: 6, kind: input, shape index: {}]   ;;  %s1337_s7 = inlined_call_operand.hbm [shape: f32[64,128], index: 7, kind: input, shape index: {}]   ;;  %s1338_s8 = inlined_call_operand.vmem [shape: f32[1,128], index: 8, kind: input, shape index: {}]   ;;  %s1339_s9 = inlined_call_operand.hbm [shape: f32[8,128], index: 9, kind: output, shape index: {}]  }
   0x1   :  { %15 = vsyncpa [#allocation6], 0 }
   0x2   :  { %16 = vsyncpa [#allocation9], 0 }
   0x3   :  { %17 = vsyncpa [#allocation4], 0  ;;  %s951_s30 = smov [#allocation5]   ;;  %s952_s11 = smov [#allocation2]  }
   0x4   :  { %s35_s10 = sshll.u32 %s951_s30, 4  ;;  %s23_s12 = sshll.u32 %s952_s11, 4  ;;  %s36_s10 = int_to_ptr.vmem [resolvable:$true] %s35_s10  ;;  %s24_s12 = int_to_ptr.vmem [resolvable:$true] %s23_s12 }
   0x5   :  { %s851_s13 = scalar_lea.vmem %s36_s10, 256  ;;  %p856_p1 = scmp.lt.s32.totalorder %s36_s10, %s36_s10 }
   0x6   :  { %p852_p0 = scmp.ne.s32.totalorder %s36_s10, %s851_s13  ;;  %p857_p2 = scmp.lt.s32.totalorder %s851_s13, %s851_s13 }
   0x8   :  { %p858_p3 = por %p857_p2, %p856_p1 }
   0xa   :  { %p859_p4 = pnand %p858_p3, %p852_p0 }
   0xc   :  { %862 = shalt.err (!%p859_p4)
}
   0xd   :  { %s953_s14 = smov 32   ;;  %s954_s15 = smov 2  }
   0xe   :  { %41 = dma.hbm_to_vmem [thread:$0]  %s1331_s1, 256, %s36_s10, [#allocation6], %s953_s14, %s953_s14, %s954_s15  }
   0xf   :  { %s871_s18 = scalar_lea.vmem %s24_s12, 256  ;;  %p876_p6 = scmp.lt.s32.totalorder %s24_s12, %s24_s12 }
  0x10   :  { %p872_p5 = scmp.ne.s32.totalorder %s24_s12, %s871_s18  ;;  %p877_p7 = scmp.lt.s32.totalorder %s871_s18, %s871_s18 }
  0x12   :  { %p878_p8 = por %p877_p7, %p876_p6 }
  0x14   :  { %p879_p9 = pnand %p878_p8, %p872_p5 }
  0x16   :  { %882 = shalt.err (!%p879_p9)
}
  0x17   :  { %29 = dma.hbm_to_vmem [thread:$0]  %s1330_s0, 256, %s24_s12, [#allocation3], %s953_s14, %s953_s14, %s954_s15  }
  0x18   :  { %s955_s21 = smov [#allocation7]  }
  0x19   :  { %s55_s22 = sshll.u32 %s955_s21, 4  ;;  %s56_s22 = int_to_ptr.vmem [resolvable:$true] %s55_s22 }
  0x1a   :  { %s891_s23 = scalar_lea.vmem %s56_s22, 1024  ;;  %p896_p11 = scmp.lt.s32.totalorder %s56_s22, %s56_s22 }
  0x1b   :  { %p892_p10 = scmp.ne.s32.totalorder %s56_s22, %s891_s23  ;;  %p897_p12 = scmp.lt.s32.totalorder %s891_s23, %s891_s23 }
  0x1d   :  { %p898_p13 = por %p897_p12, %p896_p11 }
  0x1f   :  { %p899_p0 = pnand %p898_p13, %p892_p10 }
  0x21   :  { %902 = shalt.err (!%p899_p0)
}
  0x22   :  { %s956_s1 = smov 128   ;;  %s957_s24 = smov 8  }
  0x23   :  { %61 = dma.hbm_to_vmem [thread:$0]  %s1336_s6, 1024, %s56_s22, [#allocation6], %s956_s1, %s956_s1, %s957_s24  }
  0x24   :  { %s958_s27 = smov [#allocation8]  }
  0x25   :  { %s67_s28 = sshll.u32 %s958_s27, 4  ;;  %s68_s28 = int_to_ptr.vmem [resolvable:$true] %s67_s28 }
  0x26   :  { %s911_s0 = scalar_lea.vmem %s68_s28, 1024  ;;  %p916_p2 = scmp.lt.s32.totalorder %s68_s28, %s68_s28 }
  0x27   :  { %p912_p1 = scmp.ne.s32.totalorder %s68_s28, %s911_s0  ;;  %p917_p3 = scmp.lt.s32.totalorder %s911_s0, %s911_s0 }
  0x29   :  { %p918_p4 = por %p917_p3, %p916_p2 }
  0x2b   :  { %p919_p5 = pnand %p918_p4, %p912_p1 }
  0x2d   :  { %922 = shalt.err (!%p919_p5)
}
  0x2e   :  { %73 = dma.hbm_to_vmem [thread:$0]  %s1337_s7, 1024, %s68_s28, [#allocation9], %s956_s1, %s956_s1, %s957_s24  }
  0x2f   :  { %943 = dma.done.wait [#allocation3], 256  }
  0x30   :  { %944 = vsyncadd [#allocation3], 4294967040 }
  0x31   :  { %945 = dma.done.wait [#allocation6], 1280  }
  0x32   :  { %946 = vsyncadd [#allocation6], 4294966016 }
  0x33   :  { %947 = dma.done.wait [#allocation9], 1024  }
  0x34   :  { %948 = vsyncadd [#allocation9], 4294966272  ;;  %vm120_vm0 = vcmask 519168   ;;  %v1024_v0 = vld [vmem:[#allocation2 + $0x4] sm:$0x3]  ;;  %vm960_vm1 = vmmov 0  }
  0x35   :  { %v1026_v1 = vld [vmem:[#allocation2 + $0x2] sm:$0x3]  ;;  %v1028_v2 = vld [vmem:[#allocation5 + $0x4] sm:$0x3]  ;;  %v98_v3 = vunpack.c.l.bf16 %v1024_v0  ;;  %v1033_v6 = vld [vmem:[#allocation5 + $0x2] sm:$0x3] }
  0x36   :  { %v97_v4 = vunpack.c.l.bf16 %v1026_v1  ;;  %v114_v5 = vunpack.c.l.bf16 %v1028_v2  ;;  %v113_v7 = vunpack.c.l.bf16 %v1033_v6  ;;  %v1036_v8 = vld [vmem:[#allocation2 + $0x6] sm:$0x3]  ;;  %v1038_v9 = vld [vmem:[#allocation2] sm:$0x3]  ;;  %v1054_v16 = vld [vmem:[#allocation5 + $0x6] sm:$0x3] }
  0x37   :  { %v127_v10 = vsel %vm120_vm0, %v98_v3, 0.0  ;;  %v99_v14 = vunpack.c.l.bf16 %v1036_v8  ;;  %v96_v15 = vunpack.c.l.bf16 %v1038_v9  ;;  %v1056_v17 = vld [vmem:[#allocation5] sm:$0x3]  ;;  %v115_v20 = vunpack.c.l.bf16 %v1054_v16  ;;  %v1066_v22 = vld [vmem:[#allocation5 + $0x8] sm:$0x3]  ;;  %s961_s14 = smov [#allocation10]  }
  0x38   :  { %v124_v11 = vsel %vm120_vm0, %v97_v4, 0.0  ;;  %128 = vadd.xlane.f32.xlu1 %v127_v10  ;;  %v151_v12 = vsel %vm120_vm0, %v114_v5, 0.0  ;;  %v148_v13 = vsel %vm120_vm0, %v113_v7, 0.0  ;;  %v112_v21 = vunpack.c.l.bf16 %v1056_v17  ;;  %v1068_v23 = vld [vmem:[#allocation2 + $0x8] sm:$0x3]  ;;  %s738_s15 = sshll.u32 %s961_s14, 4  ;;  %s739_s15 = int_to_ptr.vmem [resolvable:$true] %s738_s15 }
  0x39   :  { %125 = vadd.xlane.f32.xlu0 %v124_v11  ;;  %v130_v18 = vsel %vm120_vm0, %v99_v14, 0.0  ;;  %v121_v19 = vsel %vm120_vm0, %v96_v15, 0.0  ;;  %v154_v24 = vsel %vm120_vm0, %v115_v20, 0.0  ;;  %v116_v26 = vunpack.c.l.bf16 %v1066_v22  ;;  %v1078_v28 = vld [vmem:[#allocation5 + $0xa] sm:$0x3]  ;;  %p928_p7 = scmp.lt.s32.totalorder %s739_s15, %s739_s15 }
  0x3a   :  { %v145_v25 = vsel %vm120_vm0, %v112_v21, 0.0  ;;  %v100_v27 = vunpack.c.l.bf16 %v1068_v23  ;;  %v1080_v29 = vld [vmem:[#allocation2 + $0xa] sm:$0x3]  ;;  %v117_v32 = vunpack.c.l.bf16 %v1078_v28  ;;  %v1090_v34 = vld [vmem:[#allocation5 + $0xc] sm:$0x3]  ;;  %vm527_vm2 = vcmask 1041409  }
  0x3b   :  { %v157_v30 = vsel %vm120_vm0, %v116_v26, 0.0  ;;  %v101_v33 = vunpack.c.l.bf16 %v1080_v29  ;;  %v1092_v35 = vld [vmem:[#allocation2 + $0xc] sm:$0x3]  ;;  %v118_v38 = vunpack.c.l.bf16 %v1090_v34  ;;  %v1102_v40 = vld [vmem:[#allocation5 + $0xe] sm:$0x3]  ;;  %vm530_vm3 = vcmask 1042434  }
  0x3c   :  { %152 = vadd.xlane.f32.xlu1 %v151_v12  ;;  %v133_v31 = vsel %vm120_vm0, %v100_v27, 0.0  ;;  %v160_v36 = vsel %vm120_vm0, %v117_v32, 0.0  ;;  %v102_v39 = vunpack.c.l.bf16 %v1092_v35  ;;  %v1104_v41 = vld [vmem:[#allocation2 + $0xe] sm:$0x3]  ;;  %v119_v44 = vunpack.c.l.bf16 %v1102_v40 }
  0x3d   :  { %149 = vadd.xlane.f32.xlu0 %v148_v13  ;;  %v136_v37 = vsel %vm120_vm0, %v101_v33, 0.0  ;;  %v163_v42 = vsel %vm120_vm0, %v118_v38, 0.0  ;;  %v103_v45 = vunpack.c.l.bf16 %v1104_v41  ;;  %vm533_vm4 = vcmask 1043459  }
  0x3e   :  { %v139_v43 = vsel %vm120_vm0, %v102_v39, 0.0  ;;  %v166_v46 = vsel %vm120_vm0, %v119_v44, 0.0  ;;  %vm536_vm5 = vcmask 1044484   ;;  %vm539_vm6 = vcmask 1045509  }
  0x3f   :  { %v142_v47 = vsel %vm120_vm0, %v103_v45, 0.0  ;;  %vm542_vm7 = vcmask 1046534   ;;  %vm545_vm8 = vcmask 1047559   ;;  %vm547_vm9 = vcmask 523264  }
  0x40   :  { %131 = vadd.xlane.f32.xlu1 %v130_v18 }
  0x41   :  { %122 = vadd.xlane.f32.xlu0 %v121_v19 }
  0x44   :  { %155 = vadd.xlane.f32.xlu1 %v154_v24 }
  0x45   :  { %146 = vadd.xlane.f32.xlu0 %v145_v25 }
  0x48   :  { %158 = vadd.xlane.f32.xlu1 %v157_v30 }
  0x49   :  { %134 = vadd.xlane.f32.xlu0 %v133_v31 }
  0x4c   :  { %161 = vadd.xlane.f32.xlu1 %v160_v36 }
  0x4d   :  { %137 = vadd.xlane.f32.xlu0 %v136_v37 }
  0x50   :  { %164 = vadd.xlane.f32.xlu1 %v163_v42 }
  0x51   :  { %140 = vadd.xlane.f32.xlu0 %v139_v43 }
  0x54   :  { %167 = vadd.xlane.f32.xlu1 %v166_v46 }
  0x55   :  { %143 = vadd.xlane.f32.xlu0 %v142_v47 }
  0xc1   :  { %v129_v48 = vpop.xlane.xlu1 %128 }
  0xc2   :  { %v126_v49 = vpop.xlane.xlu0 %125 }
  0xc5   :  { %v153_v50 = vpop.xlane.xlu1 %152 }
  0xc6   :  { %v150_v51 = vpop.xlane.xlu0 %149  ;;  %v171_v52 = vadd.f32 %v153_v50, %v129_v48 }
  0xc7   :  { %v170_v53 = vadd.f32 %v150_v51, %v126_v49 }
  0xc8   :  { %v179_v54 = vmul.f32 0.0078125, %v171_v52 }
  0xc9   :  { %v178_v55 = vmul.f32 0.0078125, %v170_v53  ;;  %v132_v56 = vpop.xlane.xlu1 %131 }
  0xca   :  { %v123_v57 = vpop.xlane.xlu0 %122  ;;  %v1122_v58 = vsub.f32 %v98_v3, %v179_v54  ;;  %v1126_v59 = vsub.f32 %v114_v5, %v179_v54 }
  0xcb   :  { %v1130_v60 = vsub.f32 %v97_v4, %v178_v55  ;;  %v1134_v61 = vsub.f32 %v113_v7, %v178_v55 }
  0xcc   :  { %v235_v2 = vmul.f32 %v1126_v59, %v1126_v59  ;;  %v203_v1 = vmul.f32 %v1122_v58, %v1122_v58 }
  0xcd   :  { %v234_v62 = vmul.f32 %v1134_v61, %v1134_v61  ;;  %v202_v63 = vmul.f32 %v1130_v60, %v1130_v60  ;;  %v156_v0 = vpop.xlane.xlu1 %155 }
  0xce   :  { %v147_v3 = vpop.xlane.xlu0 %146  ;;  %v172_v4 = vadd.f32 %v156_v0, %v132_v56  ;;  %v247_v12 = vsel %vm120_vm0, %v235_v2, 0.0  ;;  %v215_v13 = vsel %vm120_vm0, %v203_v1, 0.0 }
  0xcf   :  { %v169_v5 = vadd.f32 %v147_v3, %v123_v57  ;;  %v244_v6 = vsel %vm120_vm0, %v234_v62, 0.0  ;;  %v212_v7 = vsel %vm120_vm0, %v202_v63, 0.0 }
  0xd0   :  { %245 = vadd.xlane.f32.xlu1 %v244_v6  ;;  %213 = vadd.xlane.f32.xlu0 %v212_v7  ;;  %v180_v10 = vmul.f32 0.0078125, %v172_v4  ;;  %v959_v6 = vmov 0.0   ;;  %v516_v7 = vld [vmem:[#allocation8 + $0x30] sm:$0xff] }
  0xd1   :  { %v177_v11 = vmul.f32 0.0078125, %v169_v5  ;;  %v159_v18 = vpop.xlane.xlu1 %158  ;;  %774 = vmatprep.subr.mxu0 %v959_v6  ;;  %793 = vmatprep.subr.mxu1 %v959_v6 }
  0xd2   :  { %v135_v19 = vpop.xlane.xlu0 %134  ;;  %v1150_v24 = vsub.f32 %v99_v14, %v180_v10  ;;  %v1154_v25 = vsub.f32 %v115_v20, %v180_v10  ;;  %v508_v10 = vld [vmem:[#allocation7 + $0x30] sm:$0xff]  ;;  %790 = vmatprep.mubr.msk.f32.mxu0 %vm960_vm1, %v959_v6  ;;  %809 = vmatprep.mubr.msk.f32.mxu1 %vm960_vm1, %v959_v6 }
  0xd3   :  { %v1158_v30 = vsub.f32 %v96_v15, %v177_v11  ;;  %v1162_v31 = vsub.f32 %v112_v21, %v177_v11  ;;  %v173_v36 = vadd.f32 %v159_v18, %v135_v19  ;;  %v515_v11 = vld [vmem:[#allocation8 + $0x28] sm:$0xff]  ;;  %v506_v18 = vld [vmem:[#allocation7 + $0x20] sm:$0xff]  ;;  %v513_v19 = vld [vmem:[#allocation8 + $0x18] sm:$0xff] }
  0xd4   :  { %248 = vadd.xlane.f32.xlu1 %v247_v12  ;;  %216 = vadd.xlane.f32.xlu0 %v215_v13  ;;  %v204_v8 = vmul.f32 %v1150_v24, %v1150_v24  ;;  %v236_v9 = vmul.f32 %v1154_v25, %v1154_v25  ;;  %v507_v12 = vld [vmem:[#allocation7 + $0x28] sm:$0xff]  ;;  %v514_v13 = vld [vmem:[#allocation8 + $0x20] sm:$0xff] }
  0xd5   :  { %v201_v14 = vmul.f32 %v1158_v30, %v1158_v30  ;;  %v181_v16 = vmul.f32 0.0078125, %v173_v36  ;;  %v162_v20 = vpop.xlane.xlu1 %161  ;;  %v233_v42 = vmul.f32 %v1162_v31, %v1162_v31  ;;  %v505_v36 = vld [vmem:[#allocation7 + $0x18] sm:$0xff] }
  0xd6   :  { %v138_v37 = vpop.xlane.xlu0 %137  ;;  %v218_v15 = vsel %vm120_vm0, %v204_v8, 0.0  ;;  %v250_v48 = vsel %vm120_vm0, %v236_v9, 0.0  ;;  %v512_v8 = vld [vmem:[#allocation8 + $0x10] sm:$0xff]  ;;  %v502_v9 = vld [vmem:[#allocation7] sm:$0xff] }
  0xd7   :  { %v209_v17 = vsel %vm120_vm0, %v201_v14, 0.0  ;;  %v174_v21 = vadd.f32 %v162_v20, %v138_v37  ;;  %v1176_v43 = vsub.f32 %v100_v27, %v181_v16  ;;  %v1180_v46 = vsub.f32 %v116_v26, %v181_v16  ;;  %v504_v14 = vld [vmem:[#allocation7 + $0x10] sm:$0xff]  ;;  %v511_v16 = vld [vmem:[#allocation8 + $0x8] sm:$0xff]  ;;  %v510_v37 = vld [vmem:[#allocation8] sm:$0xff] }
  0xd8   :  { %219 = vadd.xlane.f32.xlu1 %v218_v15  ;;  %210 = vadd.xlane.f32.xlu0 %v209_v17  ;;  %v241_v26 = vsel %vm120_vm0, %v233_v42, 0.0  ;;  %v503_v20 = vld [vmem:[#allocation7 + $0x8] sm:$0xff] }
  0xd9   :  { %v182_v47 = vmul.f32 0.0078125, %v174_v21  ;;  %v165_v49 = vpop.xlane.xlu1 %164  ;;  %v237_v51 = vmul.f32 %v1180_v46, %v1180_v46  ;;  %v205_v52 = vmul.f32 %v1176_v43, %v1176_v43 }
  0xda   :  { %v141_v50 = vpop.xlane.xlu0 %140 }
  0xdb   :  { %v1189_v23 = vsub.f32 %v101_v33, %v182_v47  ;;  %v1193_v22 = vsub.f32 %v117_v32, %v182_v47  ;;  %v175_v27 = vadd.f32 %v165_v49, %v141_v50  ;;  %v253_v53 = vsel %vm120_vm0, %v237_v51, 0.0 }
  0xdc   :  { %251 = vadd.xlane.f32.xlu1 %v250_v48  ;;  %242 = vadd.xlane.f32.xlu0 %v241_v26  ;;  %v221_v55 = vsel %vm120_vm0, %v205_v52, 0.0 }
  0xdd   :  { %v183_v54 = vmul.f32 0.0078125, %v175_v27  ;;  %v238_v56 = vmul.f32 %v1193_v22, %v1193_v22  ;;  %v206_v29 = vmul.f32 %v1189_v23, %v1189_v23  ;;  %v168_v33 = vpop.xlane.xlu1 %167 }
  0xde   :  { %v144_v28 = vpop.xlane.xlu0 %143 }
  0xdf   :  { %v1204_v32 = vsub.f32 %v102_v39, %v183_v54  ;;  %v1208_v57 = vsub.f32 %v118_v38, %v183_v54  ;;  %v176_v62 = vadd.f32 %v168_v33, %v144_v28  ;;  %v256_v63 = vsel %vm120_vm0, %v238_v56, 0.0 }
  0xe0   :  { %254 = vadd.xlane.f32.xlu1 %v253_v53  ;;  %222 = vadd.xlane.f32.xlu0 %v221_v55  ;;  %v224_v3 = vsel %vm120_vm0, %v206_v29, 0.0 }
  0xe1   :  { %v184_v0 = vmul.f32 0.0078125, %v176_v62  ;;  %v239_v2 = vmul.f32 %v1208_v57, %v1208_v57  ;;  %v207_v35 = vmul.f32 %v1204_v32, %v1204_v32 }
  0xe3   :  { %v1218_v39 = vsub.f32 %v103_v45, %v184_v0  ;;  %v1222_v34 = vsub.f32 %v119_v44, %v184_v0  ;;  %v259_v38 = vsel %vm120_vm0, %v239_v2, 0.0  ;;  %v227_v1 = vsel %vm120_vm0, %v207_v35, 0.0  ;;  %v517_v44 = vld [vmem:[#allocation8 + $0x38] sm:$0xff] }
  0xe4   :  { %257 = vadd.xlane.f32.xlu1 %v256_v63  ;;  %225 = vadd.xlane.f32.xlu0 %v224_v3  ;;  %v509_v45 = vld [vmem:[#allocation7 + $0x38] sm:$0xff] }
  0xe5   :  { %v240_v4 = vmul.f32 %v1222_v34, %v1222_v34  ;;  %v208_v5 = vmul.f32 %v1218_v39, %v1218_v39  ;;  %775 = vmatpush3.msra.mxu0 %v517_v44  ;;  %794 = vmatpush3.msra.mxu1 %v509_v45 }
  0xe6   :  { %776 = vmatprep.subr.mxu0 %v959_v6  ;;  %795 = vmatprep.subr.mxu1 %v959_v6 }
  0xe7   :  { %v262_v41 = vsel %vm120_vm0, %v240_v4, 0.0  ;;  %v230_v40 = vsel %vm120_vm0, %v208_v5, 0.0  ;;  %777 = vmatpush3.msra.mxu0 %v516_v7  ;;  %796 = vmatpush3.msra.mxu1 %v508_v10 }
  0xe8   :  { %260 = vadd.xlane.f32.xlu1 %v259_v38  ;;  %228 = vadd.xlane.f32.xlu0 %v227_v1 }
  0xe9   :  { %778 = vmatprep.subr.mxu0 %v959_v6  ;;  %797 = vmatprep.subr.mxu1 %v959_v6 }
  0xea   :  { %779 = vmatpush3.msra.mxu0 %v515_v11  ;;  %798 = vmatpush3.msra.mxu1 %v507_v12 }
  0xeb   :  { %780 = vmatprep.subr.mxu0 %v959_v6  ;;  %799 = vmatprep.subr.mxu1 %v959_v6 }
  0xec   :  { %263 = vadd.xlane.f32.xlu1 %v262_v41  ;;  %231 = vadd.xlane.f32.xlu0 %v230_v40 }
  0xed   :  { %781 = vmatpush3.msra.mxu0 %v514_v13  ;;  %800 = vmatpush3.msra.mxu1 %v506_v18 }
  0xee   :  { %782 = vmatprep.subr.mxu0 %v959_v6  ;;  %801 = vmatprep.subr.mxu1 %v959_v6 }
  0xef   :  { %783 = vmatpush3.msra.mxu0 %v513_v19  ;;  %802 = vmatpush3.msra.mxu1 %v505_v36 }
  0xf0   :  { %784 = vmatprep.subr.mxu0 %v959_v6  ;;  %803 = vmatprep.subr.mxu1 %v959_v6 }
  0xf1   :  { %785 = vmatpush3.msra.mxu0 %v512_v8  ;;  %804 = vmatpush3.msra.mxu1 %v504_v14 }
  0xf2   :  { %786 = vmatprep.subr.mxu0 %v959_v6  ;;  %805 = vmatprep.subr.mxu1 %v959_v6 }
  0xf3   :  { %787 = vmatpush3.msra.mxu0 %v511_v16  ;;  %806 = vmatpush3.msra.mxu1 %v503_v20 }
  0xf4   :  { %788 = vmatprep.subr.mxu0 %v959_v6  ;;  %807 = vmatprep.subr.mxu1 %v959_v6 }
  0xf5   :  { %789 = vmatpush3.msra.mxu0 %v510_v37  ;;  %808 = vmatpush3.msra.mxu1 %v502_v9 }
 0x159   :  { %v246_v15 = vpop.xlane.xlu1 %245  ;;  %v214_v17 = vpop.xlane.xlu0 %213 }
 0x15a   :  { %v266_v21 = vadd.f32 %v246_v15, %v214_v17 }
 0x15c   :  { %v274_v42 = vmul.f32 0.0078125, %v266_v21 }
 0x15d   :  { %v249_v47 = vpop.xlane.xlu1 %248  ;;  %v217_v48 = vpop.xlane.xlu0 %216 }
 0x15e   :  { %v282_v49 = vadd.f32 1e-05, %v274_v42  ;;  %v267_v50 = vadd.f32 %v249_v47, %v217_v48 }
 0x160   :  { %v275_v51 = vmul.f32 0.0078125, %v267_v50  ;;  %823 = vrsqrt.f32 %v282_v49 }
 0x161   :  { %v220_v52 = vpop.xlane.xlu1 %219  ;;  %v211_v26 = vpop.xlane.xlu0 %210 }
 0x162   :  { %v283_v27 = vadd.f32 1e-05, %v275_v51 }
 0x164   :  { %825 = vrsqrt.f32 %v283_v27 }
 0x165   :  { %v252_v53 = vpop.xlane.xlu1 %251  ;;  %v243_v54 = vpop.xlane.xlu0 %242 }
 0x166   :  { %v268_v55 = vadd.f32 %v252_v53, %v220_v52  ;;  %v265_v56 = vadd.f32 %v243_v54, %v211_v26 }
 0x168   :  { %v276_v29 = vmul.f32 0.0078125, %v268_v55  ;;  %v273_v33 = vmul.f32 0.0078125, %v265_v56 }
 0x169   :  { %v255_v28 = vpop.xlane.xlu1 %254  ;;  %v223_v62 = vpop.xlane.xlu0 %222 }
 0x16a   :  { %v284_v63 = vadd.f32 1e-05, %v276_v29  ;;  %v281_v0 = vadd.f32 1e-05, %v273_v33  ;;  %v269_v3 = vadd.f32 %v255_v28, %v223_v62 }
 0x16c   :  { %827 = vrsqrt.f32 %v284_v63  ;;  %v277_v2 = vmul.f32 0.0078125, %v269_v3 }
 0x16d   :  { %829 = vrsqrt.f32 %v281_v0  ;;  %v258_v35 = vpop.xlane.xlu1 %257  ;;  %v226_v38 = vpop.xlane.xlu0 %225 }
 0x16e   :  { %v824_v1 = vpop.eup %823  ;;  %v285_v4 = vadd.f32 1e-05, %v277_v2  ;;  %v270_v5 = vadd.f32 %v258_v35, %v226_v38 }
 0x16f   :  { %v298_v40 = vmul.f32 %v824_v1, %v1130_v60  ;;  %v371_v6 = vmul.f32 %v824_v1, %v1134_v61 }
 0x170   :  { %831 = vrsqrt.f32 %v285_v4  ;;  %v278_v41 = vmul.f32 0.0078125, %v270_v5 }
 0x171   :  { %v261_v44 = vpop.xlane.xlu1 %260  ;;  %v229_v45 = vpop.xlane.xlu0 %228  ;;  %v312_v13 = vsel %vm120_vm0, %v298_v40, 0.0  ;;  %v385_v18 = vsel %vm120_vm0, %v371_v6, 0.0 }
 0x172   :  { %v286_v7 = vadd.f32 1e-05, %v278_v41  ;;  %v271_v10 = vadd.f32 %v261_v44, %v229_v45  ;;  %v826_v11 = vpop.eup %825  ;;  %v313_v14 = vrot.slane %v312_v13, 4  ;;  %v386_v16 = vrot.slane %v385_v18, 4 }
 0x173   :  { %v372_v19 = vmul.f32 %v826_v11, %v1126_v59  ;;  %v299_v8 = vmul.f32 %v826_v11, %v1122_v58 }
 0x174   :  { %833 = vrsqrt.f32 %v286_v7  ;;  %v279_v12 = vmul.f32 0.0078125, %v271_v10  ;;  %v314_v15 = vadd.f32 %v313_v14, %v312_v13  ;;  %v387_v48 = vadd.f32 %v386_v16, %v385_v18 }
 0x175   :  { %v392_v61 = vsel %vm120_vm0, %v372_v19, 0.0  ;;  %v319_v9 = vsel %vm120_vm0, %v299_v8, 0.0  ;;  %v264_v42 = vpop.xlane.xlu1 %263  ;;  %v232_v58 = vpop.xlane.xlu0 %231 }
 0x176   :  { %v287_v36 = vadd.f32 1e-05, %v279_v12  ;;  %v393_v49 = vrot.slane %v392_v61, 4  ;;  %v320_v50 = vrot.slane %v319_v9, 4  ;;  %v272_v53 = vadd.f32 %v264_v42, %v232_v58 }
 0x177   :  { %v315_v54 = vrot.slane %v314_v15, 2  ;;  %v388_v28 = vrot.slane %v387_v48, 2 }
 0x178   :  { %835 = vrsqrt.f32 %v287_v36  ;;  %v394_v56 = vadd.f32 %v393_v49, %v392_v61  ;;  %v321_v62 = vadd.f32 %v320_v50, %v319_v9  ;;  %v280_v35 = vmul.f32 0.0078125, %v272_v53 }
 0x179   :  { %v828_v60 = vpop.eup %827  ;;  %v316_v38 = vadd.f32 %v315_v54, %v314_v15  ;;  %v389_v44 = vadd.f32 %v388_v28, %v387_v48 }
 0x17a   :  { %v830_v20 = vpop.eup %829  ;;  %v373_v37 = vmul.f32 %v828_v60, %v1154_v25  ;;  %v300_v51 = vmul.f32 %v828_v60, %v1150_v24  ;;  %v395_v4 = vrot.slane %v394_v56, 2  ;;  %v322_v10 = vrot.slane %v321_v62, 2 }
 0x17b   :  { %v297_v21 = vmul.f32 %v830_v20, %v1158_v30  ;;  %v370_v59 = vmul.f32 %v830_v20, %v1162_v31  ;;  %v288_v13 = vadd.f32 1e-05, %v280_v35 }
 0x17c   :  { %v399_v17 = vsel %vm120_vm0, %v373_v37, 0.0  ;;  %v326_v24 = vsel %vm120_vm0, %v300_v51, 0.0  ;;  %v396_v36 = vadd.f32 %v395_v4, %v394_v56  ;;  %v323_v42 = vadd.f32 %v322_v10, %v321_v62 }
 0x17d   :  { %v832_v47 = vpop.eup %831  ;;  %v305_v52 = vsel %vm120_vm0, %v297_v21, 0.0  ;;  %v378_v25 = vsel %vm120_vm0, %v370_v59, 0.0  ;;  %v400_v26 = vrot.slane %v399_v17, 4  ;;  %v327_v5 = vrot.slane %v326_v24, 4 }
 0x17e   :  { %v379_v27 = vrot.slane %v378_v25, 4  ;;  %v301_v30 = vmul.f32 %v832_v47, %v1176_v43  ;;  %v374_v31 = vmul.f32 %v832_v47, %v1180_v46  ;;  %v306_v29 = vrot.slane %v305_v52, 4 }
 0x17f   :  { %v401_v0 = vadd.f32 %v400_v26, %v399_v17  ;;  %v328_v8 = vadd.f32 %v327_v5, %v326_v24  ;;  %v390_v59 = vrot.slane %v389_v44, 1  ;;  %837 = vrsqrt.f32 %v288_v13 }
 0x180   :  { %v380_v33 = vadd.f32 %v379_v27, %v378_v25  ;;  %v406_v63 = vsel %vm120_vm0, %v374_v31, 0.0  ;;  %v333_v2 = vsel %vm120_vm0, %v301_v30, 0.0  ;;  %v307_v41 = vadd.f32 %v306_v29, %v305_v52 }
 0x181   :  { %v834_v55 = vpop.eup %833  ;;  %v407_v40 = vrot.slane %v406_v63, 4  ;;  %v334_v45 = vrot.slane %v333_v2, 4  ;;  %v402_v11 = vrot.slane %v401_v0, 2  ;;  %v397_v51 = vrot.slane %v396_v36, 1 }
 0x182   :  { %v381_v3 = vrot.slane %v380_v33, 2  ;;  %v302_v43 = vmul.f32 %v834_v55, %v1189_v23  ;;  %v375_v46 = vmul.f32 %v834_v55, %v1193_v22  ;;  %v308_v14 = vrot.slane %v307_v41, 2 }
 0x183   :  { %v408_v60 = vadd.f32 %v407_v40, %v406_v63  ;;  %v335_v16 = vadd.f32 %v334_v45, %v333_v2  ;;  %v403_v9 = vadd.f32 %v402_v11, %v401_v0  ;;  %v317_v27 = vrot.slane %v316_v38, 1  ;;  %v1263_v40 = vld [vmem:[%s1333_s3] ss:$0 sm:$0xff] }
 0x184   :  { %v340_v6 = vsel %vm120_vm0, %v302_v43, 0.0  ;;  %v413_v7 = vsel %vm120_vm0, %v375_v46, 0.0  ;;  %v382_v12 = vadd.f32 %v381_v3, %v380_v33  ;;  %v324_v53 = vrot.slane %v323_v42, 1 }
 0x185   :  { %v836_v1 = vpop.eup %835  ;;  %v341_v18 = vrot.slane %v340_v6, 4  ;;  %v414_v19 = vrot.slane %v413_v7, 4  ;;  %v409_v47 = vrot.slane %v408_v60, 2  ;;  %v336_v49 = vrot.slane %v335_v16, 2 }
 0x186   :  { %v303_v23 = vmul.f32 %v836_v1, %v1204_v32  ;;  %v376_v22 = vmul.f32 %v836_v1, %v1208_v57  ;;  %v383_v15 = vrot.slane %v382_v12, 1  ;;  %v329_v32 = vrot.slane %v328_v8, 2 }
 0x187   :  { %v415_v20 = vadd.f32 %v414_v19, %v413_v7  ;;  %v342_v17 = vadd.f32 %v341_v18, %v340_v6  ;;  %v309_v57 = vadd.f32 %v308_v14, %v307_v41  ;;  %v404_v52 = vrot.slane %v403_v9, 1 }
 0x188   :  { %v347_v61 = vsel %vm120_vm0, %v303_v23, 0.0  ;;  %v420_v37 = vsel %vm120_vm0, %v376_v22, 0.0  ;;  %v384_v25 = vadd.f32 %v383_v15, %v382_v12  ;;  %v391_v31 = vadd.f32 %v390_v59, %v389_v44 }
 0x189   :  { %v421_v21 = vrot.slane %v420_v37, 4  ;;  %v348_v58 = vrot.slane %v347_v61, 4  ;;  %v416_v50 = vrot.slane %v415_v20, 2  ;;  %v343_v26 = vrot.slane %v342_v17, 2 }
 0x18a   :  { %v330_v55 = vadd.f32 %v329_v32, %v328_v8  ;;  %v310_v56 = vrot.slane %v309_v57, 1  ;;  %v410_v29 = vadd.f32 %v409_v47, %v408_v60  ;;  %v337_v33 = vadd.f32 %v336_v49, %v335_v16 }
 0x18b   :  { %v422_v48 = vadd.f32 %v421_v21, %v420_v37  ;;  %v349_v54 = vadd.f32 %v348_v58, %v347_v61  ;;  %v417_v28 = vadd.f32 %v416_v50, %v415_v20  ;;  %v398_v62 = vadd.f32 %v397_v51, %v396_v36  ;;  %v1272_v20 = vld [vmem:[%s1335_s5] ss:$0 sm:$0xff] }
 0x18c   :  { %v434_v24 = vmul.f32 0.25, %v384_v25  ;;  %v405_v63 = vadd.f32 %v404_v52, %v403_v9  ;;  %v344_v0 = vadd.f32 %v343_v26, %v342_v17  ;;  %v318_v3 = vadd.f32 %v317_v27, %v316_v38  ;;  %v838_v19 = vpop.eup %837  ;;  %v1277_v37 = vld [vmem:[%s1332_s2] ss:$0 sm:$0xff] }
 0x18d   :  { %v423_v30 = vrot.slane %v422_v48, 2  ;;  %v325_v2 = vadd.f32 %v324_v53, %v323_v42  ;;  %v350_v43 = vrot.slane %v349_v54, 2  ;;  %v435_v46 = vmul.f32 0.25, %v391_v31  ;;  %v1289_v52 = vld [vmem:[%s1334_s4] ss:$0 sm:$0xff] }
 0x18e   :  { %v331_v1 = vrot.slane %v330_v55, 1  ;;  %v311_v4 = vadd.f32 %v310_v56, %v309_v57  ;;  %v411_v5 = vrot.slane %v410_v29, 1  ;;  %v418_v41 = vrot.slane %v417_v28, 1 }
 0x18f   :  { %v424_v35 = vadd.f32 %v423_v30, %v422_v48  ;;  %v338_v44 = vrot.slane %v337_v33, 1  ;;  %v351_v45 = vadd.f32 %v350_v43, %v349_v54  ;;  %v436_v6 = vmul.f32 0.25, %v398_v62 }
 0x190   :  { %v437_v7 = vmul.f32 0.25, %v405_v63  ;;  %v479_v10 = vmul.f32 %v1263_v40, %v434_v24  ;;  %v345_v38 = vrot.slane %v344_v0, 1  ;;  %v363_v11 = vmul.f32 0.25, %v318_v3 }
 0x191   :  { %v364_v12 = vmul.f32 0.25, %v325_v2  ;;  %v425_v13 = vrot.slane %v424_v35, 1  ;;  %v352_v18 = vrot.slane %v351_v45, 1  ;;  %v362_v23 = vmul.f32 0.25, %v311_v4 }
 0x192   :  { %v412_v22 = vadd.f32 %v411_v5, %v410_v29  ;;  %v480_v36 = vmul.f32 %v1263_v40, %v435_v46  ;;  %v332_v8 = vadd.f32 %v331_v1, %v330_v55  ;;  %v304_v14 = vmul.f32 %v838_v19, %v1218_v39 }
 0x193   :  { %v377_v60 = vmul.f32 %v838_v19, %v1222_v34  ;;  %v419_v16 = vadd.f32 %v418_v41, %v417_v28  ;;  %v339_v61 = vadd.f32 %v338_v44, %v337_v33  ;;  %v481_v9 = vmul.f32 %v1263_v40, %v436_v6 }
 0x194   :  { %v482_v15 = vmul.f32 %v1263_v40, %v437_v7  ;;  %v494_v39 = vadd.f32 %v1272_v20, %v479_v10  ;;  %v346_v34 = vadd.f32 %v345_v38, %v344_v0  ;;  %v426_v17 = vadd.f32 %v425_v13, %v424_v35 }
 0x195   :  { %v427_v21 = vsel %vm120_vm0, %v377_v60, 0.0  ;;  %v353_v59 = vadd.f32 %v352_v18, %v351_v45  ;;  %v354_v42 = vsel %vm120_vm0, %v304_v14, 0.0  ;;  %v365_v57 = vmul.f32 0.25, %v332_v8 }
 0x196   :  { %v428_v58 = vrot.slane %v427_v21, 4  ;;  %v355_v32 = vrot.slane %v354_v42, 4  ;;  %v450_v47 = vmul.f32 %v1277_v37, %v363_v11  ;;  %v438_v48 = vmul.f32 0.25, %v412_v22 }
 0x197   :  { %v439_v49 = vmul.f32 0.25, %v419_v16  ;;  %v495_v50 = vadd.f32 %v1272_v20, %v480_v36  ;;  %v366_v51 = vmul.f32 0.25, %v339_v61  ;;  %v367_v27 = vmul.f32 0.25, %v346_v34 }
 0x198   :  { %v429_v25 = vadd.f32 %v428_v58, %v427_v21  ;;  %v356_v26 = vadd.f32 %v355_v32, %v354_v42  ;;  %v449_v53 = vmul.f32 %v1277_v37, %v362_v23  ;;  %v440_v54 = vmul.f32 0.25, %v426_v17 }
 0x199   :  { %v496_v30 = vadd.f32 %v1272_v20, %v481_v9  ;;  %v368_v31 = vmul.f32 0.25, %v353_v59  ;;  %v451_v55 = vmul.f32 %v1277_v37, %v364_v12  ;;  %v452_v33 = vmul.f32 %v1277_v37, %v365_v57 }
 0x19a   :  { %v430_v56 = vrot.slane %v429_v25, 2  ;;  %v357_v29 = vrot.slane %v356_v26, 2  ;;  %v465_v28 = vadd.f32 %v1289_v52, %v450_v47  ;;  %v483_v62 = vmul.f32 %v1263_v40, %v438_v48 }
 0x19b   :  { %v484_v24 = vmul.f32 %v1263_v40, %v439_v49  ;;  %v497_v63 = vadd.f32 %v1272_v20, %v482_v15  ;;  %v453_v0 = vmul.f32 %v1277_v37, %v366_v51  ;;  %v454_v35 = vmul.f32 %v1277_v37, %v367_v27 }
 0x19c   :  { %v431_v3 = vadd.f32 %v430_v56, %v429_v25  ;;  %v358_v2 = vadd.f32 %v357_v29, %v356_v26  ;;  %v464_v43 = vadd.f32 %v1289_v52, %v449_v53  ;;  %v485_v46 = vmul.f32 %v1263_v40, %v440_v54 }
 0x19d   :  { %v526_v1 = vrot.slane %v495_v50, 7  ;;  %v455_v4 = vmul.f32 %v1277_v37, %v368_v31  ;;  %v466_v5 = vadd.f32 %v1289_v52, %v451_v55  ;;  %v467_v45 = vadd.f32 %v1289_v52, %v452_v33  ;;  %v755_v31 = vld [vmem:[%s1338_s8] ss:$0 sm:$0xff]  ;;  %s923_s8 = scalar_lea.vmem %s739_s15, 128 }
 0x19e   :  { %v432_v41 = vrot.slane %v431_v3, 1  ;;  %v359_v44 = vrot.slane %v358_v2, 1  ;;  %v628_v6 = vrot.slane %v465_v28, 7  ;;  %v498_v7 = vadd.f32 %v1272_v20, %v483_v62  ;;  %p924_p6 = scmp.ne.s32.totalorder %s739_s15, %s923_s8  ;;  %p929_p8 = scmp.lt.s32.totalorder %s923_s8, %s923_s8 }
 0x19f   :  { %v499_v10 = vadd.f32 %v1272_v20, %v484_v24  ;;  %v528_v38 = vsel %vm527_vm2, %v526_v1, %v494_v39  ;;  %v468_v11 = vadd.f32 %v1289_v52, %v453_v0  ;;  %v469_v18 = vadd.f32 %v1289_v52, %v454_v35 }
 0x1a0   :  { %v433_v12 = vadd.f32 %v432_v41, %v431_v3  ;;  %v360_v13 = vadd.f32 %v359_v44, %v358_v2  ;;  %v629_v19 = vsel %vm527_vm2, %v628_v6, %v464_v43  ;;  %v500_v23 = vadd.f32 %v1272_v20, %v485_v46  ;;  %p930_p9 = por %p929_p8, %p928_p7 }
 0x1a1   :  { %v529_v22 = vrot.slane %v496_v30, 6  ;;  %v470_v36 = vadd.f32 %v1289_v52, %v455_v4  ;;  %v630_v8 = vrot.slane %v466_v5, 6  ;;  %v532_v60 = vrot.slane %v497_v63, 5 }
 0x1a2   :  { %v441_v14 = vmul.f32 0.25, %v433_v12  ;;  %v369_v16 = vmul.f32 0.25, %v360_v13  ;;  %v632_v61 = vrot.slane %v467_v45, 5  ;;  %v535_v15 = vrot.slane %v498_v7, 4  ;;  %p931_p10 = pnand %p930_p9, %p924_p6 }
 0x1a3   :  { %v531_v9 = vsel %vm530_vm3, %v529_v22, %v528_v38  ;;  %v631_v39 = vsel %vm530_vm3, %v630_v8, %v629_v19  ;;  %v634_v34 = vrot.slane %v468_v11, 4  ;;  %v538_v21 = vrot.slane %v499_v10, 3 }
 0x1a4   :  { %v486_v17 = vmul.f32 %v1263_v40, %v441_v14  ;;  %v456_v59 = vmul.f32 %v1277_v37, %v369_v16  ;;  %v636_v42 = vrot.slane %v469_v18, 3  ;;  %v541_v58 = vrot.slane %v500_v23, 2 }
 0x1a5   :  { %v638_v32 = vrot.slane %v470_v36, 2  ;;  %v534_v47 = vsel %vm533_vm4, %v532_v60, %v531_v9  ;;  %v633_v49 = vsel %vm533_vm4, %v632_v61, %v631_v39 }
 0x1a6   :  { %v501_v57 = vadd.f32 %v1272_v20, %v486_v17  ;;  %v471_v48 = vadd.f32 %v1289_v52, %v456_v59  ;;  %v537_v50 = vsel %vm536_vm5, %v535_v15, %v534_v47  ;;  %v635_v40 = vsel %vm536_vm5, %v634_v34, %v633_v49 }
 0x1a7   :  { %v540_v37 = vsel %vm539_vm6, %v538_v21, %v537_v50  ;;  %v637_v25 = vsel %vm539_vm6, %v636_v42, %v635_v40 }
 0x1a8   :  { %v544_v51 = vrot.slane %v501_v57, 1  ;;  %v640_v26 = vrot.slane %v471_v48, 1  ;;  %v543_v27 = vsel %vm542_vm7, %v541_v58, %v540_v37  ;;  %v639_v53 = vsel %vm542_vm7, %v638_v32, %v637_v25 }
 0x1aa   :  { %v546_v54 = vsel %vm545_vm8, %v544_v51, %v543_v27  ;;  %v641_v20 = vsel %vm545_vm8, %v640_v26, %v639_v53 }
 0x1ab   :  { %791 = vmatmul.mubr.msk.f32.vlgmr.msra.gmra.mxu0 %vm547_vm9, %v546_v54  ;;  %810 = vmatmul.mubr.msk.f32.vlgmr.msra.gmra.mxu1 %vm547_vm9, %v641_v20 }
 0x26b   :  { %v616_v30 = vpop.f32.mrf.mxu0  ;;  %v710_v52 = vpop.f32.mrf.mxu1 }
 0x26c   :  { %v711_v55 = vadd.f32 %v710_v52, %v616_v30 }
 0x26d   :  { %v792_v56 = vpop.f32.mrf.mxu0  ;;  %v811_v29 = vpop.f32.mrf.mxu1 }
 0x26e   :  { %v721_v33 = vadd.f32 %v755_v31, %v711_v55 }
 0x270   :  { %722 = vmax.xlane.f32.xlu0 %v721_v33 }
 0x2f9   :  { %v723_v28 = vpop.xlane.xlu0 %722 }
 0x2fa   :  { %v724_v62 = vsub.f32 %v721_v33, %v723_v28 }
 0x2fc   :  { %v725_v24 = vmul.f32 1.442695, %v724_v62 }
 0x2fe   :  { %839 = vpow2.f32 %v725_v24 }
 0x30b   :  { %v840_v63 = vpop.eup %839 }
 0x30c   :  { %727 = vadd.xlane.f32.xlu1 %v840_v63 }
 0x395   :  { %v728_v0 = vpop.xlane.xlu1 %727 }
 0x396   :  { %841 = vrcp.f32 %v728_v0 }
 0x3a3   :  { %v842_v3 = vpop.eup %841 }
 0x3a4   :  { %v730_v2 = vmul.f32 %v842_v3, %v840_v63 }
 0x3a6   :  { %731 = vst [vmem:[#allocation10] sm:$0xff] %v730_v2 }
 0x3a7   :  { %934 = shalt.err (!%p931_p10)
}
 0x3a8   :  { %741 = dma.vmem_to_hbm [thread:$0]  %s739_s15, 128, %s1339_s9, [#allocation4]  }
 0x3a9   :  { %949 = dma.done.wait [#allocation4], 128  }
 0x3aa   :  { %950 = vsyncadd [#allocation4], 4294967168 }
 0x3ab   :  { %745 = vsyncpa [#allocation3], 1 }
 0x3ac   :  { %746 = vsyncpa [#allocation6], 1 }
 0x3ad   :  { %747 = vsyncpa [#allocation9], 1 }
 0x3ae   :  { %748 = vsyncpa [#allocation4], 1 }

</bundles_post_ra>
